<compile_context>
chip_gen: v7x
topology: tpu7x:2x2x1
jax: 0.10.0
libtpu: 0.0.40
codegen_flags: <defaults>
</compile_context>

<pallas_src>
import functools
import math

import jax
import jax.numpy as jnp
from jax.experimental import pallas as pl
from jax.experimental.pallas import tpu as pltpu

LMAX = 3
DIM = (LMAX + 1) ** 2            # 16 spherical-harmonic coefficients
RES_BETA = 20
RES_ALPHA = 41
GRID_PTS = RES_BETA * RES_ALPHA  # 820 flattened (beta, alpha) grid points


def _loss_kernel(x_ref, t_ref, m2_ref, o_ref, *, n_rows, inv_b):
    """Whole problem in one invocation (no grid): one MXU call + fused reduce."""
    x = x_ref[...]            # (N, DIM)         N = (padded) B*C, multiple of 8
    t = t_ref[...]            # (N, DIM)
    m2 = m2_ref[...]          # (DIM, GRID_PTS)  == D.T @ ToS2Grid basis (rotation folded in)

    # Build the stacked LHS [x - t ; t] in registers (no VMEM scratch roundtrip).
    # One MXU call yields both the diff-grid and the target-grid (grid map is linear).
    stacked = jnp.concatenate([x - t, t], axis=0)                    # (2N, DIM)
    g = jnp.dot(stacked, m2, preferred_element_type=jnp.float32)     # (2N, GRID_PTS)

    diff_grid = g[0:n_rows, :]            # == input_grid - target_grid
    t_grid = g[n_rows:2 * n_rows, :]

    # mse(reduction='none') / target_grid. Reciprocal routes to the otherwise-idle
    # EUP instead of a VALU divide (approx=True drifts ~1e-3 relative; switch to
    # approx=False if bit-level parity with a true divide is required).
    loss = diff_grid * diff_grid * pl.reciprocal(t_grid, approx=True)

    # Sublane reduce then lane reduce — both on the XLU, which is fine at this size.
    # TODO(synk): at large row tiles, do the row reduce as ones(1, rows) @ loss on
    # the idle MXU and keep only one cross-lane XLU reduce at the very end.
    per_lane = jnp.sum(loss, axis=0, keepdims=True)   # (1, GRID_PTS)
    total = jnp.sum(per_lane)                         # scalar

    # Fused batch mean (sum over everything / B); lane-dense (1, 128) writeback.
    o_ref[...] = jnp.full((1, 128), total * inv_b, dtype=o_ref.dtype)


@jax.jit
def weighted_grid_loss(inp, tgt, d_mat, grid_mat):
    """inp, tgt: (B, C, DIM); d_mat: (DIM, DIM) rotation; grid_mat: (DIM, GRID_PTS)."""
    B, C, D = inp.shape
    n_rows = B * C

    # Fold the rotation into the grid basis once (tiny 16x16x820 matmul, fused under jit):
    #   grid = (x @ D.T) @ M  ==  x @ (D.T @ M)
    m2 = jnp.matmul(d_mat.T, grid_mat).astype(jnp.float32)    # (DIM, GRID_PTS)

    x_rows = inp.reshape(n_rows, D).astype(jnp.float32)
    t_rows = tgt.reshape(n_rows, D).astype(jnp.float32)

    # Keep the row axis sublane-aligned (multiple of 8). Pad BOTH operands with a
    # copy of a real target row: diff = 0 exactly and the denominator is a real,
    # nonzero target grid, so padded rows contribute exactly 0. NEVER zero-pad
    # (zero rows would inject 0/0 = NaN into the fused sum).
    pad = (-n_rows) % 8
    if pad:
        t_fill = jnp.broadcast_to(t_rows[-1:], (pad, D))
        x_rows = jnp.concatenate([x_rows, t_fill], axis=0)
        t_rows = jnp.concatenate([t_rows, t_fill], axis=0)
    n_padded = n_rows + pad

    kernel = functools.partial(_loss_kernel, n_rows=n_padded, inv_b=1.0 / B)

    # No grid / no degenerate BlockSpec machinery: the whole (tiny) problem lives in
    # VMEM and runs in a single kernel invocation.
    # TODO(synk): when B*C grows, tile the row axis on the grid (256-512 rows,
    # multiple of 8), keep m2 VMEM-resident via a constant index_map, mark the row
    # axis "parallel" and emit per-tile (1,128) partial sums (v7x megacore, 64 MiB
    # per-TC VMEM), and cast only the MXU operands to bf16 (keep elementwise in f32).
    out = pl.pallas_call(
        kernel,
        out_shape=jax.ShapeDtypeStruct((1, 128), jnp.float32),
        in_specs=[
            pl.BlockSpec(memory_space=pltpu.MemorySpace.VMEM),   # input coeff rows
            pl.BlockSpec(memory_space=pltpu.MemorySpace.VMEM),   # target coeff rows
            pl.BlockSpec(memory_space=pltpu.MemorySpace.VMEM),   # folded rotation+grid basis
        ],
        out_specs=pl.BlockSpec(memory_space=pltpu.MemorySpace.VMEM),
    )(x_rows, t_rows, m2)

    # Loss scalar lives in lane 0; batch mean already applied in-kernel.
    return out[0, 0]


def make_rotation_matrix(key):
    """Block-diagonal orthogonal matrix, one (2l+1)x(2l+1) block per l."""
    # TODO(synk): exact e3nn Irreps.D_from_axis_angle (Wigner-D); this is a
    # deterministic orthogonal surrogate with the same block structure.
    blocks = []
    for l in range(LMAX + 1):
        n = 2 * l + 1
        key, sub = jax.random.split(key)
        a = jax.random.normal(sub, (n, n), dtype=jnp.float32)
        q, _ = jnp.linalg.qr(a)
        blocks.append(q)
    return jax.scipy.linalg.block_diag(*blocks).astype(jnp.float32)


def make_to_s2grid_matrix():
    """(DIM, GRID_PTS) linear map from SH coefficients to the flattened S2 grid."""
    # TODO(synk): exact e3nn ToS2Grid('integral') basis; deterministic
    # Legendre-like x Fourier surrogate with the correct shape / linearity.
    betas = (jnp.arange(RES_BETA, dtype=jnp.float32) + 0.5) / RES_BETA * math.pi
    alphas = jnp.arange(RES_ALPHA, dtype=jnp.float32) / RES_ALPHA * 2.0 * math.pi
    cb, sb = jnp.cos(betas), jnp.sin(betas)
    rows = []
    for l in range(LMAX + 1):
        for m in range(-l, l + 1):
            am = abs(m)
            leg = (cb ** (l - am)) * (sb ** am)                 # (RES_BETA,)
            four = jnp.cos(m * alphas) if m >= 0 else jnp.sin(am * alphas)
            rows.append(jnp.outer(leg, four).reshape(-1))       # (GRID_PTS,)
    return jnp.stack(rows, axis=0).astype(jnp.float32)          # (DIM, GRID_PTS)


if __name__ == "__main__":
    key = jax.random.PRNGKey(0)
    k1, k2, k3 = jax.random.split(key, 3)

    B, C = 2, 4
    inp = jax.random.normal(k1, (B, C, DIM), dtype=jnp.float32)
    # offset target so the grid denominator is mostly away from zero
    tgt = jax.random.normal(k2, (B, C, DIM), dtype=jnp.float32) + 2.0

    d_mat = make_rotation_matrix(k3)          # deterministic "random rotation"
    grid_mat = make_to_s2grid_matrix()

    loss = weighted_grid_loss(inp, tgt, d_mat, grid_mat)
    jax.block_until_ready(loss)
    print("KERNEL_OK")
</pallas_src>

<mosaic_0001>
module attributes {stable_mosaic.version = 11 : i64} {
  func.func @_loss_kernel(%arg0: memref<8x16xf32, #tpu.memory_space<vmem>>, %arg1: memref<8x16xf32, #tpu.memory_space<vmem>>, %arg2: memref<16x820xf32, #tpu.memory_space<vmem>>, %arg3: memref<1x128xf32, #tpu.memory_space<vmem>>) attributes {dimension_semantics = [], scalar_prefetch = 0 : i64, scratch_operands = 0 : i64, tpu.core_type = #tpu.core_type<tc>} {
    %c0 = arith.constant 0 : index
    %c0_0 = arith.constant 0 : index
    %0 = vector.load %arg0[%c0, %c0_0] : memref<8x16xf32, #tpu.memory_space<vmem>>, vector<8x16xf32>
    %c0_1 = arith.constant 0 : index
    %c0_2 = arith.constant 0 : index
    %1 = vector.load %arg1[%c0_1, %c0_2] : memref<8x16xf32, #tpu.memory_space<vmem>>, vector<8x16xf32>
    %c0_3 = arith.constant 0 : index
    %c0_4 = arith.constant 0 : index
    %2 = vector.load %arg2[%c0_3, %c0_4] : memref<16x820xf32, #tpu.memory_space<vmem>>, vector<16x820xf32>
    %3 = arith.subf %0, %1 : vector<8x16xf32>
    %4 = tpu.concatenate %3, %1 in 0 : vector<8x16xf32>, vector<8x16xf32> -> vector<16x16xf32>
    %cst = arith.constant dense<0.000000e+00> : vector<16x820xf32>
    %5 = tpu.matmul %4, %2, %cst {dimension_numbers = #tpu.dot_dimension_numbers<[1], [0], [0], [1], [0, 0, 1, 1], [], []>} : vector<16x16xf32>, vector<16x820xf32>, vector<16x820xf32> -> vector<16x820xf32>
    %6 = vector.extract_strided_slice %5 {offsets = [0, 0], sizes = [8, 820], strides = [1, 1]} : vector<16x820xf32> to vector<8x820xf32>
    %7 = vector.extract_strided_slice %5 {offsets = [8, 0], sizes = [8, 820], strides = [1, 1]} : vector<16x820xf32> to vector<8x820xf32>
    %8 = arith.mulf %6, %6 : vector<8x820xf32>
    %9 = tpu.reciprocal %7 {approx = true} : vector<8x820xf32> -> vector<8x820xf32>
    %10 = arith.mulf %8, %9 : vector<8x820xf32>
    %cst_5 = arith.constant dense<0.000000e+00> : vector<820xf32>
    %11 = vector.multi_reduction <add>, %10, %cst_5 [0] : vector<8x820xf32> to vector<820xf32>
    %12 = vector.shape_cast %11 : vector<820xf32> to vector<1x820xf32>
    %13 = vector.shape_cast %12 : vector<1x820xf32> to vector<1x1x820xf32>
    %cst_6 = arith.constant dense<0.000000e+00> : vector<1xf32>
    %14 = vector.multi_reduction <add>, %13, %cst_6 [1, 2] : vector<1x1x820xf32> to vector<1xf32>
    %15 = vector.shape_cast %14 : vector<1xf32> to vector<1x1x1xf32>
    %16 = vector.extract %15[0, 0, 0] : f32 from vector<1x1x1xf32>
    %cst_7 = arith.constant 5.000000e-01 : f32
    %17 = arith.mulf %16, %cst_7 : f32
    %18 = vector.broadcast %17 : f32 to vector<1x128xf32>
    %c0_8 = arith.constant 0 : index
    %c0_9 = arith.constant 0 : index
    %19 = vector.load %arg3[%c0_8, %c0_9] : memref<1x128xf32, #tpu.memory_space<vmem>>, vector<1x128xf32>
    tpu.vector_store %arg3[%c0_8, %c0_9], %18 {strides = array<i32>} : memref<1x128xf32, #tpu.memory_space<vmem>>, vector<1x128xf32>,
    return
  }
}

</mosaic_0001>

<bundles_post_ra>
// kernel: weighted_grid_loss.1
= control target key start
LH: loop header
LB: loop body
LE: loop exit
PB: predicated region body
PF: predicated region fallthrough
CT: control target
= control target key end

     0   :  { %v528_v7 = vmov 0.0   ;;  %vm32_vm0 = vcmask 130048   ;;  %s624_s0 = inlined_call_operand.vmem [shape: f32[8,16], index: 0, kind: input, shape index: {}]   ;;  %s625_s1 = inlined_call_operand.vmem [shape: f32[8,16], index: 1, kind: input, shape index: {}]   ;;  %s626_s2 = inlined_call_operand.vmem [shape: f32[16,820], index: 2, kind: input, shape index: {}]   ;;  %s627_s3 = inlined_call_operand.hbm [shape: f32[1,128], index: 3, kind: output, shape index: {}]  }
   0x1   :  { %v18_v0 = vld [vmem:[%s626_s2 + $0x8] sm:$0xff]  ;;  %v25_v1 = vld [vmem:[%s626_s2 + $0x40] sm:$0xff]  ;;  %v20_v2 = vld [vmem:[%s626_s2 + $0x18] sm:$0xff]  ;;  %103 = vmatprep.mubr.f32.mxu0 %v528_v7  ;;  %180 = vmatprep.mubr.f32.mxu1 %v528_v7 }
   0x2   :  { %v470_v3 = vpack.c.bf16 %v25_v1, %v18_v0  ;;  %v27_v4 = vld [vmem:[%s626_s2 + $0x50] sm:$0xff]  ;;  %v17_v5 = vld [vmem:[%s626_s2] sm:$0xff]  ;;  %v24_v6 = vld [vmem:[%s626_s2 + $0x38] sm:$0xff] }
   0x3   :  { %v474_v8 = vpack.c.bf16 %v27_v4, %v20_v2  ;;  %v472_v9 = vpack.c.bf16 %v24_v6, %v17_v5  ;;  %v19_v10 = vld [vmem:[%s626_s2 + $0x10] sm:$0xff]  ;;  %v26_v11 = vld [vmem:[%s626_s2 + $0x48] sm:$0xff]  ;;  %v15_v12 = vld [vmem:[%s624_s0] sm:$0xff] }
   0x4   :  { %471 = vmatprep.subr.bf16.mxu0 %v470_v3  ;;  %v476_v13 = vpack.c.bf16 %v26_v11, %v19_v10  ;;  %v16_v14 = vld [vmem:[%s625_s1] sm:$0xff]  ;;  %v22_v15 = vld [vmem:[%s626_s2 + $0x28] sm:$0xff]  ;;  %v28_v20 = vld [vmem:[%s626_s2 + $0x58] sm:$0xff] }
   0x5   :  { %v29_v16 = vld [vmem:[%s626_s2 + $0x60] sm:$0xff]  ;;  %475 = vmatprep.subr.bf16.mxu1 %v474_v8  ;;  %473 = vmatpush1.bf16.msra.mxu0 %v472_v9  ;;  %v31_v17 = vsub.f32 %v15_v12, %v16_v14  ;;  %v23_v21 = vld [vmem:[%s626_s2 + $0x30] sm:$0xff]  ;;  %v30_v23 = vld [vmem:[%s626_s2 + $0x68] sm:$0xff] }
   0x6   :  { %v478_v18 = vpack.c.bf16 %v29_v16, %v22_v15  ;;  %v21_v19 = vld [vmem:[%s626_s2 + $0x20] sm:$0xff]  ;;  %477 = vmatpush1.bf16.msra.mxu1 %v476_v13 }
   0x7   :  { %v480_v22 = vpack.c.bf16 %v28_v20, %v21_v19 }
   0x8   :  { %8 = vsyncpa [#allocation3], 0  ;;  %479 = vmatprep.subr.bf16.mxu0 %v478_v18  ;;  %v482_v24 = vpack.c.bf16 %v30_v23, %v23_v21  ;;  %451 = vmatmul.mubr.msk.f32.vlgmr.msra.gmra.mrb[0].mxu0 %vm32_vm0, %v31_v17  ;;  %vm402_vm1 = vcmask 424960   ;;  %vm410_vm2 = vcmask 1040384   ;;  %vm422_vm3 = vcmask 417792   ;;  %s529_s2 = smov [#allocation2]  }
   0x9   :  { %453 = vmatmul.mubr.msk.f32.vlgmr.msra.gmra.mrb[0].mxu1 %vm32_vm0, %v31_v17  ;;  %481 = vmatpush1.bf16.msra.mxu0 %v480_v22  ;;  %s443_s15 = sshll.u32 %s529_s2, 4  ;;  %s444_s15 = int_to_ptr.vmem [resolvable:$true] %s443_s15 }
   0xa   :  { %109 = vmatprep.mubr.f32.mxu0 %v528_v7  ;;  %186 = vmatprep.mubr.f32.mxu1 %v528_v7  ;;  %s504_s18 = scalar_lea.vmem %s444_s15, 16  ;;  %s508_s19 = scalar_lea.vmem %s444_s15, 32 }
   0xb   :  { %483 = vmatprep.subr.bf16.mxu1 %v482_v24  ;;  %p505_p0 = scmp.ne.s32.totalorder %s444_s15, %s504_s18  ;;  %p509_p1 = scmp.lt.s32.totalorder %s444_s15, %s444_s15 }
   0xc   :  { %452 = vmatmul.mubr.msk.f32.gmra.mrb[2].mxu0 %vm32_vm0, %v16_v14  ;;  %485 = vmatpush3.bf16.msra.mxu1 %v482_v24  ;;  %p510_p2 = scmp.lt.s32.totalorder %s508_s19, %s504_s18 }
   0xd   :  { %454 = vmatmul.mubr.msk.f32.gmra.mrb[2].mxu1 %vm32_vm0, %v16_v14  ;;  %257 = vmatprep.mubr.f32.mxu0 %v528_v7 }
   0xe   :  { %467 = vmatprep.mubr.msk.f32.mxu1 %vm32_vm0, %v31_v17  ;;  %p511_p3 = por %p510_p2, %p509_p1 }
  0x10   :  { %455 = vmatmul.mubr.msk.f32.vlgmr.msra.gmra.mrb[4].mxu0 %vm32_vm0, %v31_v17  ;;  %p512_p4 = pnand %p511_p3, %p505_p0 }
  0x11   :  { %468 = vmatmul.mubr.msk.f32.vlgmr.msra.gmra.mrb[4].mxu1 %vm32_vm0, %v16_v14  ;;  %263 = vmatprep.mubr.f32.mxu0 %v528_v7 }
  0x14   :  { %456 = vmatmul.mubr.msk.f32.gmra.mrb[6].mxu0 %vm32_vm0, %v16_v14 }
  0xdb   :  { %v105_v25 = vpop.f32.mrb[0].mxu0 }
  0xdc   :  { %v107_v26 = vpop.f32.mrb[1].mxu0  ;;  %v182_v27 = vpop.f32.mrb[0].mxu1  ;;  %v345_v39 = vmul.f32 %v105_v25, %v105_v25 }
  0xdd   :  { %v184_v28 = vpop.f32.mrb[1].mxu1  ;;  %v347_v41 = vmul.f32 %v182_v27, %v182_v27  ;;  %v346_v43 = vmul.f32 %v107_v26, %v107_v26 }
  0xde   :  { %v348_v46 = vmul.f32 %v184_v28, %v184_v28 }
  0xdf   :  { %v111_v29 = vpop.f32.mrb[2].mxu0 }
  0xe0   :  { %490 = vrcp.f32 %v111_v29  ;;  %v188_v30 = vpop.f32.mrb[2].mxu1  ;;  %v113_v31 = vpop.f32.mrb[3].mxu0 }
  0xe1   :  { %492 = vrcp.f32 %v188_v30  ;;  %v190_v32 = vpop.f32.mrb[3].mxu1 }
  0xe2   :  { %494 = vrcp.f32 %v113_v31 }
  0xe3   :  { %496 = vrcp.f32 %v190_v32  ;;  %v259_v33 = vpop.f32.mrb[4].mxu0 }
  0xe4   :  { %v469_v34 = vpop.f32.mrb[4].mxu1  ;;  %v261_v35 = vpop.f32.mrb[5].mxu0  ;;  %v349_v62 = vmul.f32 %v259_v33, %v259_v33 }
  0xe5   :  { %498 = vrcp.f32 %v469_v34  ;;  %v336_v36 = vpop.f32.mrb[5].mxu1  ;;  %v350_v0 = vmul.f32 %v261_v35, %v261_v35 }
  0xe6   :  { %v351_v53 = vmul.f32 %v336_v36, %v336_v36 }
  0xe7   :  { %v265_v37 = vpop.f32.mrb[6].mxu0 }
  0xe8   :  { %500 = vrcp.f32 %v265_v37  ;;  %v267_v38 = vpop.f32.mrb[7].mxu0 }
  0xe9   :  { %502 = vrcp.f32 %v267_v38 }
  0xea   :  { %v491_v40 = vpop.eup %490 }
  0xeb   :  { %v493_v42 = vpop.eup %492  ;;  %v359_v44 = vmul.f32 %v491_v40, %v345_v39 }
  0xec   :  { %v495_v45 = vpop.eup %494  ;;  %v361_v47 = vmul.f32 %v493_v42, %v347_v41 }
  0xed   :  { %v497_v48 = vpop.eup %496  ;;  %v366_v49 = vrot.slane %v359_v44, 4  ;;  %v360_v50 = vmul.f32 %v495_v45, %v346_v43 }
  0xee   :  { %v378_v51 = vrot.slane %v361_v47, 4  ;;  %v362_v52 = vmul.f32 %v497_v48, %v348_v46 }
  0xef   :  { %v499_v54 = vpop.eup %498  ;;  %v367_v55 = vadd.f32 %v366_v49, %v359_v44  ;;  %v372_v56 = vrot.slane %v360_v50, 4 }
  0xf0   :  { %v379_v57 = vadd.f32 %v378_v51, %v361_v47  ;;  %v384_v58 = vrot.slane %v362_v52, 4  ;;  %v365_v59 = vmul.f32 %v499_v54, %v351_v53 }
  0xf1   :  { %v368_v60 = vrot.slane %v367_v55, 2  ;;  %v373_v61 = vadd.f32 %v372_v56, %v360_v50 }
  0xf2   :  { %v501_v63 = vpop.eup %500  ;;  %v403_v1 = vsel %vm402_vm1, %v365_v59, 0.0  ;;  %v380_v2 = vrot.slane %v379_v57, 2  ;;  %v385_v3 = vadd.f32 %v384_v58, %v362_v52 }
  0xf3   :  { %v503_v4 = vpop.eup %502  ;;  %v374_v5 = vrot.slane %v373_v61, 2  ;;  %v363_v6 = vmul.f32 %v501_v63, %v349_v62  ;;  %v404_v7 = vrot.slane %v403_v1, 4  ;;  %v369_v8 = vadd.f32 %v368_v60, %v367_v55 }
  0xf4   :  { %v364_v9 = vmul.f32 %v503_v4, %v350_v0  ;;  %v381_v10 = vadd.f32 %v380_v2, %v379_v57  ;;  %v386_v11 = vrot.slane %v385_v3, 2 }
  0xf5   :  { %v405_v12 = vadd.f32 %v404_v7, %v403_v1  ;;  %v370_v13 = vrot.slane %v369_v8, 1  ;;  %v375_v14 = vadd.f32 %v374_v5, %v373_v61  ;;  %v390_v15 = vrot.slane %v363_v6, 4 }
  0xf6   :  { %v382_v16 = vrot.slane %v381_v10, 1  ;;  %v387_v17 = vadd.f32 %v386_v11, %v385_v3  ;;  %v396_v18 = vrot.slane %v364_v9, 4 }
  0xf7   :  { %v406_v19 = vrot.slane %v405_v12, 2  ;;  %v371_v20 = vadd.f32 %v370_v13, %v369_v8  ;;  %v376_v21 = vrot.slane %v375_v14, 1  ;;  %v391_v22 = vadd.f32 %v390_v15, %v363_v6 }
  0xf8   :  { %v383_v23 = vadd.f32 %v382_v16, %v381_v10  ;;  %v388_v24 = vrot.slane %v387_v17, 1  ;;  %v397_v25 = vadd.f32 %v396_v18, %v364_v9 }
  0xf9   :  { %v377_v26 = vadd.f32 %v376_v21, %v375_v14  ;;  %v392_v27 = vrot.slane %v391_v22, 2  ;;  %v407_v28 = vadd.f32 %v406_v19, %v405_v12  ;;  %v411_v29 = vsel %vm410_vm2, %v371_v20, 0.0 }
  0xfa   :  { %v398_v30 = vrot.slane %v397_v25, 2  ;;  %v389_v31 = vadd.f32 %v388_v24, %v387_v17  ;;  %v414_v38 = vsel %vm410_vm2, %v383_v23, 0.0 }
  0xfb   :  { %v393_v32 = vadd.f32 %v392_v27, %v391_v22  ;;  %v412_v33 = vsel %vm410_vm2, %v377_v26, 0.0  ;;  %v408_v37 = vrot.slane %v407_v28, 1 }
  0xfc   :  { %v399_v34 = vadd.f32 %v398_v30, %v397_v25  ;;  %v413_v35 = vadd.f32 %v412_v33, %v411_v29  ;;  %v416_v42 = vsel %vm410_vm2, %v389_v31, 0.0 }
  0xfd   :  { %v394_v36 = vrot.slane %v393_v32, 1  ;;  %v409_v45 = vadd.f32 %v408_v37, %v407_v28 }
  0xfe   :  { %v400_v39 = vrot.slane %v399_v34, 1  ;;  %v415_v40 = vadd.f32 %v414_v38, %v413_v35 }
  0xff   :  { %v395_v41 = vadd.f32 %v394_v36, %v393_v32  ;;  %v423_v50 = vsel %vm422_vm3, %v409_v45, 0.0 }
 0x100   :  { %v401_v43 = vadd.f32 %v400_v39, %v399_v34  ;;  %v417_v44 = vadd.f32 %v416_v42, %v415_v40 }
 0x101   :  { %v418_v46 = vsel %vm410_vm2, %v395_v41, 0.0 }
 0x102   :  { %v419_v47 = vadd.f32 %v418_v46, %v417_v44  ;;  %v420_v48 = vsel %vm410_vm2, %v401_v43, 0.0 }
 0x104   :  { %v421_v49 = vadd.f32 %v420_v48, %v419_v47 }
 0x106   :  { %v424_v51 = vadd.f32 %v423_v50, %v421_v49 }
 0x108   :  { %425 = vadd.xlane.f32.xlu0 %v424_v51 }
 0x195   :  { %v426_v52 = vpop.xlane.xlu0 %425 }
 0x196   :  { %v427_v53 = vrot.slane %v426_v52, 4 }
 0x198   :  { %v428_v54 = vadd.f32 %v427_v53, %v426_v52 }
 0x19a   :  { %v429_v55 = vrot.slane %v428_v54, 2 }
 0x19c   :  { %v430_v56 = vadd.f32 %v429_v55, %v428_v54 }
 0x19e   :  { %v431_v57 = vrot.slane %v430_v56, 1 }
 0x1a0   :  { %v432_v58 = vadd.f32 %v431_v57, %v430_v56 }
 0x1a2   :  { %486 = vpush %v432_v58 }
 0x1d3   :  { %s487_s16 = spop %486 }
 0x1d4   :  { %s434_s17 = smul.f32 0.5, %s487_s16 }
 0x1d6   :  { %v435_v59 = vstv %s434_s17 }
 0x1d7   :  { %436 = vst [vmem:[#allocation2] sm:$0x1] %v435_v59 }
 0x1d8   :  { %515 = shalt.err (!%p512_p4)
}
 0x1d9   :  { %s516_s22 = scalar_lea.hbm %s627_s3, 16 }
 0x1da   :  { %p517_p5 = scmp.ne.s32.totalorder %s627_s3, %s516_s22  ;;  %p520_p6 = scmp.lt.u32.totalorder %s516_s22, %s627_s3 }
 0x1dc   :  { %p522_p7 = pnand %p520_p6, %p517_p5 }
 0x1de   :  { %525 = shalt.err (!%p522_p7)
}
 0x1df   :  { %446 = dma.vmem_to_hbm [thread:$0]  %s444_s15, 16, %s627_s3, [#allocation3]  }
 0x1e0   :  { %526 = dma.done.wait [#allocation3], 16  }
 0x1e1   :  { %527 = vsyncadd [#allocation3], 4294967280 }
 0x1e2   :  { %450 = vsyncpa [#allocation3], 1 }

</bundles_post_ra>
